<compile_context>
chip_gen: v5e
topology: v5e:2x2
jax: 0.10.0
libtpu: 0.0.40
codegen_flags: <defaults>
</compile_context>

<pallas_src>
import jax
import jax.numpy as jnp
from jax import lax
from jax.experimental import pallas as pl
from jax.experimental.pallas import tpu as pltpu

# ---------------- model dimensions (consistent with the PyTorch module) ------
B = 2            # batch
A_CH = 4         # audio "channel" axis of x['audio'] (forward takes [:, 0, :])
AL = 128         # raw audio length fed to the (synthetic) audio model
AFS = 64         # audio_model.get_feature_size()
TL = 8           # text sequence length (token ids)
VOCAB = 32       # synthetic vocab for the stand-in language model
TXT_H = 768      # BERT hidden size hard-coded in the module (Linear(768 + AFS, ...))
OUT = 128        # output_size
NUM_CLASS = 4    # num_class

LANE = 128       # lane width; every slab section / intermediate is 128 lanes wide

# ---------------- packed weight slab layout (rows, all 128 lanes wide) -------
WA_OFF = 0                  # (AL, LANE)   : cols :AFS  = wa,  rest 0
W1A_OFF = WA_OFF + AL       # (LANE, LANE) : rows :AFS  = w1a, rest 0
W2_OFF = W1A_OFF + LANE     # (OUT, LANE)  : cols :NUM_CLASS = w2, rest 0
EW_OFF = W2_OFF + OUT       # (VOCAB, LANE): (emb @ w1t) / TL   (the algebraic fold)
BIAS_OFF = EW_OFF + VOCAB   # (8, LANE)    : row0 = ba(:AFS), row1 = b1, row2 = b2(:NUM_CLASS)
SLAB_ROWS = BIAS_OFF + 8    # 424 rows -> ~217 KB resident in VMEM


# ---------------- Pallas kernel: fully fused forward --------------------------
def bpm_st_kernel(ids_ref,     # (B, TL) int32 — scalar-prefetched (SMEM)
                  audio_ref,   # (B*A_CH, AL) f32 — flattened audio, ch-0 rows strided
                  slab_ref,    # (SLAB_ROWS, LANE) f32 — packed weights/biases
                  out_ref):    # (B, LANE) f32 — cols :NUM_CLASS are the logits
    # ---- text branch: token counts @ pre-folded (emb @ w1t)/TL table --------
    # Gather + mean-pool + fc1(text half) collapse into one K=VOCAB matmul.
    # TODO(synk): real module uses a pretrained BERT; embedding mean-pool stand-in.
    # Note: out-of-range token ids would silently contribute 0 while the mean
    # still divides by TL (acceptable for this synthetic stand-in).
    row_iota = lax.broadcasted_iota(jnp.int32, (B, VOCAB), 0)
    col_iota = lax.broadcasted_iota(jnp.int32, (B, VOCAB), 1)
    cnt = jnp.zeros((B, VOCAB), jnp.float32)
    for b in range(B):                       # static unroll; per-b partial sums
        hits = jnp.zeros((B, VOCAB), jnp.float32)
        for t in range(TL):
            hits = hits + jnp.where(col_iota == ids_ref[b, t], 1.0, 0.0)
        cnt = cnt + jnp.where(row_iota == b, hits, 0.0)
    text_h = jnp.dot(cnt, slab_ref[EW_OFF:EW_OFF + VOCAB, :],
                     preferred_element_type=jnp.float32)            # (B, OUT)

    # ---- biases (single aligned 8-row block read, then cheap value slices) --
    biases = slab_ref[BIAS_OFF:BIAS_OFF + 8, :]
    ba = biases[0:1, :]                                              # (1, LANE) cols>=AFS are 0
    b1 = biases[1:2, :]
    b2 = biases[2:3, :]

    # ---- audio branch: channel-0 rows via strided sublane load (no scratch) -
    audio_raw = audio_ref[pl.ds(0, B, stride=A_CH), :]               # (B, AL)

    # synthetic audio backbone: Linear(AL -> AFS) + ReLU (lane-padded to 128,
    # pad columns come out exactly 0 so they add nothing downstream)
    audio_feat = jnp.maximum(
        jnp.dot(audio_raw, slab_ref[WA_OFF:WA_OFF + AL, :],
                preferred_element_type=jnp.float32) + ba, 0.0)       # (B, LANE)

    # fc_layer_1 over the virtual concat [audio_feat, text_feat]: split matmul,
    # text half already folded into text_h.  Dropout == identity in eval mode.
    h = jnp.maximum(
        jnp.dot(audio_feat, slab_ref[W1A_OFF:W1A_OFF + LANE, :],
                preferred_element_type=jnp.float32) + text_h + b1, 0.0)

    # classifier — lane-padded so the store is a single dense full-block tile
    logits = jnp.dot(h, slab_ref[W2_OFF:W2_OFF + OUT, :],
                     preferred_element_type=jnp.float32) + b2
    out_ref[...] = logits.astype(out_ref.dtype)


@jax.jit
def bpm_st_forward(x_audio, x_text_ids, slab):
    """x_audio: (B, A_CH, AL) f32, x_text_ids: (B, TL) int32 -> logits (B, NUM_CLASS)."""
    # Free contiguous reshape (metadata only); channel-0 rows picked in-kernel.
    audio_flat = x_audio.reshape(B * A_CH, AL)

    flops = 2 * B * (VOCAB * OUT + AL * LANE + LANE * LANE + OUT * LANE)
    bytes_accessed = 4 * (SLAB_ROWS * LANE + B * A_CH * AL + B * LANE + B * TL)

    grid_spec = pltpu.PrefetchScalarGridSpec(
        num_scalar_prefetch=1,                              # token ids -> SMEM
        grid=(1,),
        in_specs=[
            pl.BlockSpec((B * A_CH, AL), lambda i, ids: (0, 0)),      # audio (full block)
            pl.BlockSpec((SLAB_ROWS, LANE), lambda i, ids: (0, 0)),   # packed weight slab
        ],
        out_specs=pl.BlockSpec((B, LANE), lambda i, ids: (0, 0)),
    )

    logits_pad = pl.pallas_call(
        bpm_st_kernel,
        out_shape=jax.ShapeDtypeStruct((B, LANE), jnp.float32),
        grid_spec=grid_spec,
        compiler_params=pltpu.CompilerParams(dimension_semantics=("arbitrary",)),
        cost_estimate=pl.CostEstimate(flops=flops, transcendentals=0,
                                      bytes_accessed=bytes_accessed),
    )(x_text_ids, audio_flat, slab)

    return logits_pad[:, :NUM_CLASS]


# ---------------- deterministic parameter init (synthetic, not a checkpoint) -
def init_params(key):
    ks = jax.random.split(key, 8)
    scale = 0.05
    return {
        # synthetic audio_model: Linear(AL, AFS)
        "wa":  jax.random.normal(ks[0], (AL, AFS), jnp.float32) * scale,
        "ba":  jax.random.normal(ks[1], (1, AFS), jnp.float32) * scale,
        # fc_layer_1: Linear(AFS + 768, OUT), split into audio / text halves
        "w1a": jax.random.normal(ks[2], (AFS, OUT), jnp.float32) * scale,
        "w1t": jax.random.normal(ks[3], (TXT_H, OUT), jnp.float32) * scale,
        "b1":  jax.random.normal(ks[4], (1, OUT), jnp.float32) * scale,
        # classifier: Linear(OUT, NUM_CLASS)
        "w2":  jax.random.normal(ks[5], (OUT, NUM_CLASS), jnp.float32) * scale,
        "b2":  jax.random.normal(ks[6], (1, NUM_CLASS), jnp.float32) * scale,
        # synthetic language_model: token embedding table (VOCAB, 768)
        "emb": jax.random.normal(ks[7], (VOCAB, TXT_H), jnp.float32) * scale,
    }


def pack_params(p):
    """Fold (emb @ w1t)/TL offline and pack everything into one lane-dense slab."""
    emb_w1t = (p["emb"] @ p["w1t"]) * (1.0 / TL)                    # (VOCAB, OUT)
    slab = jnp.zeros((SLAB_ROWS, LANE), jnp.float32)
    slab = slab.at[WA_OFF:WA_OFF + AL, :AFS].set(p["wa"])
    slab = slab.at[W1A_OFF:W1A_OFF + AFS, :OUT].set(p["w1a"])
    slab = slab.at[W2_OFF:W2_OFF + OUT, :NUM_CLASS].set(p["w2"])
    slab = slab.at[EW_OFF:EW_OFF + VOCAB, :OUT].set(emb_w1t)
    slab = slab.at[BIAS_OFF + 0, :AFS].set(p["ba"][0])
    slab = slab.at[BIAS_OFF + 1, :OUT].set(p["b1"][0])
    slab = slab.at[BIAS_OFF + 2, :NUM_CLASS].set(p["b2"][0])
    return slab


if __name__ == "__main__":
    key = jax.random.PRNGKey(0)
    kp, ka, kt = jax.random.split(key, 3)
    params = init_params(kp)
    slab = pack_params(params)

    # x['audio']: (B, A_CH, AL) waveform-like; forward uses [:, 0, :]
    x_audio = jax.random.normal(ka, (B, A_CH, AL), jnp.float32)
    # x['text']: (B, TL) integer token ids
    x_text = jax.random.randint(kt, (B, TL), 0, VOCAB, dtype=jnp.int32)

    logits = bpm_st_forward(x_audio, x_text, slab)
    logits = jax.block_until_ready(logits)
    assert logits.shape == (B, NUM_CLASS), logits.shape

    # pure-JAX reference of the same math (loose tol: MXU f32 path + fold reorder)
    audio_raw = x_audio[:, 0, :]
    text_feat = jnp.mean(params["emb"][x_text], axis=1)
    a_feat = jax.nn.relu(audio_raw @ params["wa"] + params["ba"])
    h = jax.nn.relu(a_feat @ params["w1a"] + text_feat @ params["w1t"] + params["b1"])
    ref = h @ params["w2"] + params["b2"]
    err = float(jnp.max(jnp.abs(logits - ref)))
    assert err < 5e-2, f"max abs err {err}"

    print("KERNEL_OK")
</pallas_src>

<mosaic_0001>
module attributes {stable_mosaic.version = 11 : i64} {
  func.func @bpm_st_kernel(%arg0: i32, %arg1: memref<2x8xi32, #tpu.memory_space<smem>>, %arg2: memref<8x128xf32, #tpu.memory_space<vmem>>, %arg3: memref<424x128xf32, #tpu.memory_space<vmem>>, %arg4: memref<2x128xf32, #tpu.memory_space<vmem>>) attributes {dimension_semantics = [#tpu.dimension_semantics<arbitrary>], iteration_bounds = array<i64: 1>, scalar_prefetch = 1 : i64, scratch_operands = 0 : i64, tpu.core_type = #tpu.core_type<tc>, window_params = [{pipeline_mode = #tpu.pipeline_mode<synchronous>, transform_indices = @transform_0, window_bounds = array<i64: 8, 128>}, {pipeline_mode = #tpu.pipeline_mode<synchronous>, transform_indices = @transform_1, window_bounds = array<i64: 424, 128>}, {pipeline_mode = #tpu.pipeline_mode<synchronous>, transform_indices = @transform_2, window_bounds = array<i64: 2, 128>}]} {
    %0 = tpu.iota {dimensions = array<i32: 0>} : vector<2x32xi32>
    %1 = tpu.iota {dimensions = array<i32: 1>} : vector<2x32xi32>
    %cst = arith.constant 0.000000e+00 : f32
    %2 = vector.broadcast %cst : f32 to vector<2x32xf32>
    %cst_0 = arith.constant 0.000000e+00 : f32
    %3 = vector.broadcast %cst_0 : f32 to vector<2x32xf32>
    %c0 = arith.constant 0 : index
    %c0_1 = arith.constant 0 : index
    %4 = memref.load %arg1[%c0, %c0_1] : memref<2x8xi32, #tpu.memory_space<smem>>
    %5 = vector.broadcast %4 : i32 to vector<2x32xi32>
    %6 = arith.cmpi eq, %1, %5 : vector<2x32xi32>
    %cst_2 = arith.constant 1.000000e+00 : f32
    %cst_3 = arith.constant 0.000000e+00 : f32
    %7 = vector.broadcast %cst_2 : f32 to vector<2x32xf32>
    %8 = vector.broadcast %cst_3 : f32 to vector<2x32xf32>
    %9 = arith.select %6, %7, %8 : vector<2x32xi1>, vector<2x32xf32>
    %10 = arith.addf %3, %9 : vector<2x32xf32>
    %c0_4 = arith.constant 0 : index
    %c1 = arith.constant 1 : index
    %11 = memref.load %arg1[%c0_4, %c1] : memref<2x8xi32, #tpu.memory_space<smem>>
    %12 = vector.broadcast %11 : i32 to vector<2x32xi32>
    %13 = arith.cmpi eq, %1, %12 : vector<2x32xi32>
    %cst_5 = arith.constant 1.000000e+00 : f32
    %cst_6 = arith.constant 0.000000e+00 : f32
    %14 = vector.broadcast %cst_5 : f32 to vector<2x32xf32>
    %15 = vector.broadcast %cst_6 : f32 to vector<2x32xf32>
    %16 = arith.select %13, %14, %15 : vector<2x32xi1>, vector<2x32xf32>
    %17 = arith.addf %10, %16 : vector<2x32xf32>
    %c0_7 = arith.constant 0 : index
    %c2 = arith.constant 2 : index
    %18 = memref.load %arg1[%c0_7, %c2] : memref<2x8xi32, #tpu.memory_space<smem>>
    %19 = vector.broadcast %18 : i32 to vector<2x32xi32>
    %20 = arith.cmpi eq, %1, %19 : vector<2x32xi32>
    %cst_8 = arith.constant 1.000000e+00 : f32
    %cst_9 = arith.constant 0.000000e+00 : f32
    %21 = vector.broadcast %cst_8 : f32 to vector<2x32xf32>
    %22 = vector.broadcast %cst_9 : f32 to vector<2x32xf32>
    %23 = arith.select %20, %21, %22 : vector<2x32xi1>, vector<2x32xf32>
    %24 = arith.addf %17, %23 : vector<2x32xf32>
    %c0_10 = arith.constant 0 : index
    %c3 = arith.constant 3 : index
    %25 = memref.load %arg1[%c0_10, %c3] : memref<2x8xi32, #tpu.memory_space<smem>>
    %26 = vector.broadcast %25 : i32 to vector<2x32xi32>
    %27 = arith.cmpi eq, %1, %26 : vector<2x32xi32>
    %cst_11 = arith.constant 1.000000e+00 : f32
    %cst_12 = arith.constant 0.000000e+00 : f32
    %28 = vector.broadcast %cst_11 : f32 to vector<2x32xf32>
    %29 = vector.broadcast %cst_12 : f32 to vector<2x32xf32>
    %30 = arith.select %27, %28, %29 : vector<2x32xi1>, vector<2x32xf32>
    %31 = arith.addf %24, %30 : vector<2x32xf32>
    %c0_13 = arith.constant 0 : index
    %c4 = arith.constant 4 : index
    %32 = memref.load %arg1[%c0_13, %c4] : memref<2x8xi32, #tpu.memory_space<smem>>
    %33 = vector.broadcast %32 : i32 to vector<2x32xi32>
    %34 = arith.cmpi eq, %1, %33 : vector<2x32xi32>
    %cst_14 = arith.constant 1.000000e+00 : f32
    %cst_15 = arith.constant 0.000000e+00 : f32
    %35 = vector.broadcast %cst_14 : f32 to vector<2x32xf32>
    %36 = vector.broadcast %cst_15 : f32 to vector<2x32xf32>
    %37 = arith.select %34, %35, %36 : vector<2x32xi1>, vector<2x32xf32>
    %38 = arith.addf %31, %37 : vector<2x32xf32>
    %c0_16 = arith.constant 0 : index
    %c5 = arith.constant 5 : index
    %39 = memref.load %arg1[%c0_16, %c5] : memref<2x8xi32, #tpu.memory_space<smem>>
    %40 = vector.broadcast %39 : i32 to vector<2x32xi32>
    %41 = arith.cmpi eq, %1, %40 : vector<2x32xi32>
    %cst_17 = arith.constant 1.000000e+00 : f32
    %cst_18 = arith.constant 0.000000e+00 : f32
    %42 = vector.broadcast %cst_17 : f32 to vector<2x32xf32>
    %43 = vector.broadcast %cst_18 : f32 to vector<2x32xf32>
    %44 = arith.select %41, %42, %43 : vector<2x32xi1>, vector<2x32xf32>
    %45 = arith.addf %38, %44 : vector<2x32xf32>
    %c0_19 = arith.constant 0 : index
    %c6 = arith.constant 6 : index
    %46 = memref.load %arg1[%c0_19, %c6] : memref<2x8xi32, #tpu.memory_space<smem>>
    %47 = vector.broadcast %46 : i32 to vector<2x32xi32>
    %48 = arith.cmpi eq, %1, %47 : vector<2x32xi32>
    %cst_20 = arith.constant 1.000000e+00 : f32
    %cst_21 = arith.constant 0.000000e+00 : f32
    %49 = vector.broadcast %cst_20 : f32 to vector<2x32xf32>
    %50 = vector.broadcast %cst_21 : f32 to vector<2x32xf32>
    %51 = arith.select %48, %49, %50 : vector<2x32xi1>, vector<2x32xf32>
    %52 = arith.addf %45, %51 : vector<2x32xf32>
    %c0_22 = arith.constant 0 : index
    %c7 = arith.constant 7 : index
    %53 = memref.load %arg1[%c0_22, %c7] : memref<2x8xi32, #tpu.memory_space<smem>>
    %54 = vector.broadcast %53 : i32 to vector<2x32xi32>
    %55 = arith.cmpi eq, %1, %54 : vector<2x32xi32>
    %cst_23 = arith.constant 1.000000e+00 : f32
    %cst_24 = arith.constant 0.000000e+00 : f32
    %56 = vector.broadcast %cst_23 : f32 to vector<2x32xf32>
    %57 = vector.broadcast %cst_24 : f32 to vector<2x32xf32>
    %58 = arith.select %55, %56, %57 : vector<2x32xi1>, vector<2x32xf32>
    %59 = arith.addf %52, %58 : vector<2x32xf32>
    %c0_i32 = arith.constant 0 : i32
    %60 = vector.broadcast %c0_i32 : i32 to vector<2x32xi32>
    %61 = arith.cmpi eq, %0, %60 : vector<2x32xi32>
    %cst_25 = arith.constant 0.000000e+00 : f32
    %62 = vector.broadcast %cst_25 : f32 to vector<2x32xf32>
    %63 = arith.select %61, %59, %62 : vector<2x32xi1>, vector<2x32xf32>
    %64 = arith.addf %2, %63 : vector<2x32xf32>
    %cst_26 = arith.constant 0.000000e+00 : f32
    %65 = vector.broadcast %cst_26 : f32 to vector<2x32xf32>
    %c1_27 = arith.constant 1 : index
    %c0_28 = arith.constant 0 : index
    %66 = memref.load %arg1[%c1_27, %c0_28] : memref<2x8xi32, #tpu.memory_space<smem>>
    %67 = vector.broadcast %66 : i32 to vector<2x32xi32>
    %68 = arith.cmpi eq, %1, %67 : vector<2x32xi32>
    %cst_29 = arith.constant 1.000000e+00 : f32
    %cst_30 = arith.constant 0.000000e+00 : f32
    %69 = vector.broadcast %cst_29 : f32 to vector<2x32xf32>
    %70 = vector.broadcast %cst_30 : f32 to vector<2x32xf32>
    %71 = arith.select %68, %69, %70 : vector<2x32xi1>, vector<2x32xf32>
    %72 = arith.addf %65, %71 : vector<2x32xf32>
    %c1_31 = arith.constant 1 : index
    %c1_32 = arith.constant 1 : index
    %73 = memref.load %arg1[%c1_31, %c1_32] : memref<2x8xi32, #tpu.memory_space<smem>>
    %74 = vector.broadcast %73 : i32 to vector<2x32xi32>
    %75 = arith.cmpi eq, %1, %74 : vector<2x32xi32>
    %cst_33 = arith.constant 1.000000e+00 : f32
    %cst_34 = arith.constant 0.000000e+00 : f32
    %76 = vector.broadcast %cst_33 : f32 to vector<2x32xf32>
    %77 = vector.broadcast %cst_34 : f32 to vector<2x32xf32>
    %78 = arith.select %75, %76, %77 : vector<2x32xi1>, vector<2x32xf32>
    %79 = arith.addf %72, %78 : vector<2x32xf32>
    %c1_35 = arith.constant 1 : index
    %c2_36 = arith.constant 2 : index
    %80 = memref.load %arg1[%c1_35, %c2_36] : memref<2x8xi32, #tpu.memory_space<smem>>
    %81 = vector.broadcast %80 : i32 to vector<2x32xi32>
    %82 = arith.cmpi eq, %1, %81 : vector<2x32xi32>
    %cst_37 = arith.constant 1.000000e+00 : f32
    %cst_38 = arith.constant 0.000000e+00 : f32
    %83 = vector.broadcast %cst_37 : f32 to vector<2x32xf32>
    %84 = vector.broadcast %cst_38 : f32 to vector<2x32xf32>
    %85 = arith.select %82, %83, %84 : vector<2x32xi1>, vector<2x32xf32>
    %86 = arith.addf %79, %85 : vector<2x32xf32>
    %c1_39 = arith.constant 1 : index
    %c3_40 = arith.constant 3 : index
    %87 = memref.load %arg1[%c1_39, %c3_40] : memref<2x8xi32, #tpu.memory_space<smem>>
    %88 = vector.broadcast %87 : i32 to vector<2x32xi32>
    %89 = arith.cmpi eq, %1, %88 : vector<2x32xi32>
    %cst_41 = arith.constant 1.000000e+00 : f32
    %cst_42 = arith.constant 0.000000e+00 : f32
    %90 = vector.broadcast %cst_41 : f32 to vector<2x32xf32>
    %91 = vector.broadcast %cst_42 : f32 to vector<2x32xf32>
    %92 = arith.select %89, %90, %91 : vector<2x32xi1>, vector<2x32xf32>
    %93 = arith.addf %86, %92 : vector<2x32xf32>
    %c1_43 = arith.constant 1 : index
    %c4_44 = arith.constant 4 : index
    %94 = memref.load %arg1[%c1_43, %c4_44] : memref<2x8xi32, #tpu.memory_space<smem>>
    %95 = vector.broadcast %94 : i32 to vector<2x32xi32>
    %96 = arith.cmpi eq, %1, %95 : vector<2x32xi32>
    %cst_45 = arith.constant 1.000000e+00 : f32
    %cst_46 = arith.constant 0.000000e+00 : f32
    %97 = vector.broadcast %cst_45 : f32 to vector<2x32xf32>
    %98 = vector.broadcast %cst_46 : f32 to vector<2x32xf32>
    %99 = arith.select %96, %97, %98 : vector<2x32xi1>, vector<2x32xf32>
    %100 = arith.addf %93, %99 : vector<2x32xf32>
    %c1_47 = arith.constant 1 : index
    %c5_48 = arith.constant 5 : index
    %101 = memref.load %arg1[%c1_47, %c5_48] : memref<2x8xi32, #tpu.memory_space<smem>>
    %102 = vector.broadcast %101 : i32 to vector<2x32xi32>
    %103 = arith.cmpi eq, %1, %102 : vector<2x32xi32>
    %cst_49 = arith.constant 1.000000e+00 : f32
    %cst_50 = arith.constant 0.000000e+00 : f32
    %104 = vector.broadcast %cst_49 : f32 to vector<2x32xf32>
    %105 = vector.broadcast %cst_50 : f32 to vector<2x32xf32>
    %106 = arith.select %103, %104, %105 : vector<2x32xi1>, vector<2x32xf32>
    %107 = arith.addf %100, %106 : vector<2x32xf32>
    %c1_51 = arith.constant 1 : index
    %c6_52 = arith.constant 6 : index
    %108 = memref.load %arg1[%c1_51, %c6_52] : memref<2x8xi32, #tpu.memory_space<smem>>
    %109 = vector.broadcast %108 : i32 to vector<2x32xi32>
    %110 = arith.cmpi eq, %1, %109 : vector<2x32xi32>
    %cst_53 = arith.constant 1.000000e+00 : f32
    %cst_54 = arith.constant 0.000000e+00 : f32
    %111 = vector.broadcast %cst_53 : f32 to vector<2x32xf32>
    %112 = vector.broadcast %cst_54 : f32 to vector<2x32xf32>
    %113 = arith.select %110, %111, %112 : vector<2x32xi1>, vector<2x32xf32>
    %114 = arith.addf %107, %113 : vector<2x32xf32>
    %c1_55 = arith.constant 1 : index
    %c7_56 = arith.constant 7 : index
    %115 = memref.load %arg1[%c1_55, %c7_56] : memref<2x8xi32, #tpu.memory_space<smem>>
    %116 = vector.broadcast %115 : i32 to vector<2x32xi32>
    %117 = arith.cmpi eq, %1, %116 : vector<2x32xi32>
    %cst_57 = arith.constant 1.000000e+00 : f32
    %cst_58 = arith.constant 0.000000e+00 : f32
    %118 = vector.broadcast %cst_57 : f32 to vector<2x32xf32>
    %119 = vector.broadcast %cst_58 : f32 to vector<2x32xf32>
    %120 = arith.select %117, %118, %119 : vector<2x32xi1>, vector<2x32xf32>
    %121 = arith.addf %114, %120 : vector<2x32xf32>
    %c1_i32 = arith.constant 1 : i32
    %122 = vector.broadcast %c1_i32 : i32 to vector<2x32xi32>
    %123 = arith.cmpi eq, %0, %122 : vector<2x32xi32>
    %cst_59 = arith.constant 0.000000e+00 : f32
    %124 = vector.broadcast %cst_59 : f32 to vector<2x32xf32>
    %125 = arith.select %123, %121, %124 : vector<2x32xi1>, vector<2x32xf32>
    %126 = arith.addf %64, %125 : vector<2x32xf32>
    %c384 = arith.constant 384 : index
    %c0_60 = arith.constant 0 : index
    %127 = vector.load %arg3[%c384, %c0_60] : memref<424x128xf32, #tpu.memory_space<vmem>>, vector<32x128xf32>
    %cst_61 = arith.constant dense<0.000000e+00> : vector<2x128xf32>
    %128 = tpu.matmul %126, %127, %cst_61 {dimension_numbers = #tpu.dot_dimension_numbers<[1], [0], [0], [1], [0, 0, 1, 1], [], []>} : vector<2x32xf32>, vector<32x128xf32>, vector<2x128xf32> -> vector<2x128xf32>
    %c416 = arith.constant 416 : index
    %c0_62 = arith.constant 0 : index
    %129 = vector.load %arg3[%c416, %c0_62] : memref<424x128xf32, #tpu.memory_space<vmem>>, vector<8x128xf32>
    %130 = vector.extract_strided_slice %129 {offsets = [0, 0], sizes = [1, 128], strides = [1, 1]} : vector<8x128xf32> to vector<1x128xf32>
    %131 = vector.extract_strided_slice %129 {offsets = [1, 0], sizes = [1, 128], strides = [1, 1]} : vector<8x128xf32> to vector<1x128xf32>
    %132 = vector.extract_strided_slice %129 {offsets = [2, 0], sizes = [1, 128], strides = [1, 1]} : vector<8x128xf32> to vector<1x128xf32>
    %c0_63 = arith.constant 0 : index
    %c0_64 = arith.constant 0 : index
    %133 = tpu.strided_load %arg2[%c0_63, %c0_64] {strides = array<i32: 4, 1>} : memref<8x128xf32, #tpu.memory_space<vmem>>, vector<2x128xf32>
    %c0_65 = arith.constant 0 : index
    %c0_66 = arith.constant 0 : index
    %134 = vector.load %arg3[%c0_65, %c0_66] : memref<424x128xf32, #tpu.memory_space<vmem>>, vector<128x128xf32>
    %cst_67 = arith.constant dense<0.000000e+00> : vector<2x128xf32>
    %135 = tpu.matmul %133, %134, %cst_67 {dimension_numbers = #tpu.dot_dimension_numbers<[1], [0], [0], [1], [0, 0, 1, 1], [], []>} : vector<2x128xf32>, vector<128x128xf32>, vector<2x128xf32> -> vector<2x128xf32>
    %136 = vector.broadcast %130 : vector<1x128xf32> to vector<2x128xf32>
    %137 = arith.addf %135, %136 : vector<2x128xf32>
    %cst_68 = arith.constant 0.000000e+00 : f32
    %138 = vector.broadcast %cst_68 : f32 to vector<2x128xf32>
    %139 = arith.maximumf %137, %138 : vector<2x128xf32>
    %c128 = arith.constant 128 : index
    %c0_69 = arith.constant 0 : index
    %140 = vector.load %arg3[%c128, %c0_69] : memref<424x128xf32, #tpu.memory_space<vmem>>, vector<128x128xf32>
    %cst_70 = arith.constant dense<0.000000e+00> : vector<2x128xf32>
    %141 = tpu.matmul %139, %140, %cst_70 {dimension_numbers = #tpu.dot_dimension_numbers<[1], [0], [0], [1], [0, 0, 1, 1], [], []>} : vector<2x128xf32>, vector<128x128xf32>, vector<2x128xf32> -> vector<2x128xf32>
    %142 = arith.addf %141, %128 : vector<2x128xf32>
    %143 = vector.broadcast %131 : vector<1x128xf32> to vector<2x128xf32>
    %144 = arith.addf %142, %143 : vector<2x128xf32>
    %cst_71 = arith.constant 0.000000e+00 : f32
    %145 = vector.broadcast %cst_71 : f32 to vector<2x128xf32>
    %146 = arith.maximumf %144, %145 : vector<2x128xf32>
    %c256 = arith.constant 256 : index
    %c0_72 = arith.constant 0 : index
    %147 = vector.load %arg3[%c256, %c0_72] : memref<424x128xf32, #tpu.memory_space<vmem>>, vector<128x128xf32>
    %cst_73 = arith.constant dense<0.000000e+00> : vector<2x128xf32>
    %148 = tpu.matmul %146, %147, %cst_73 {dimension_numbers = #tpu.dot_dimension_numbers<[1], [0], [0], [1], [0, 0, 1, 1], [], []>} : vector<2x128xf32>, vector<128x128xf32>, vector<2x128xf32> -> vector<2x128xf32>
    %149 = vector.broadcast %132 : vector<1x128xf32> to vector<2x128xf32>
    %150 = arith.addf %148, %149 : vector<2x128xf32>
    %c0_74 = arith.constant 0 : index
    %c0_75 = arith.constant 0 : index
    %151 = vector.load %arg4[%c0_74, %c0_75] : memref<2x128xf32, #tpu.memory_space<vmem>>, vector<2x128xf32>
    tpu.vector_store %arg4[%c0_74, %c0_75], %150 {strides = array<i32>} : memref<2x128xf32, #tpu.memory_space<vmem>>, vector<2x128xf32>,
    return
  }
  func.func @transform_0(%arg0: i32, %arg1: memref<2x8xi32, #tpu.memory_space<smem>>) -> (i32, i32) {
    %c0_i32 = arith.constant 0 : i32
    %c0_i32_0 = arith.constant 0 : i32
    %c0_i32_1 = arith.constant 0 : i32
    return %c0_i32, %c0_i32_0 : i32, i32
  }
  func.func @transform_1(%arg0: i32, %arg1: memref<2x8xi32, #tpu.memory_space<smem>>) -> (i32, i32) {
    %c0_i32 = arith.constant 0 : i32
    %c0_i32_0 = arith.constant 0 : i32
    %c0_i32_1 = arith.constant 0 : i32
    return %c0_i32, %c0_i32_0 : i32, i32
  }
  func.func @transform_2(%arg0: i32, %arg1: memref<2x8xi32, #tpu.memory_space<smem>>) -> (i32, i32) {
    %c0_i32 = arith.constant 0 : i32
    %c0_i32_0 = arith.constant 0 : i32
    %c0_i32_1 = arith.constant 0 : i32
    return %c0_i32, %c0_i32_0 : i32, i32
  }
}

</mosaic_0001>

<bundles_post_ra>
// kernel: bpm_st_forward.1
= control target key start
LH: loop header
LB: loop body
LE: loop exit
PB: predicated region body
PF: predicated region fallthrough
CT: control target
= control target key end

     0   :  { %s419_s15 = smov [#allocation3]   ;;  %s524_s0 = inlined_call_operand.hbm [shape: s32[2,8], index: 0, kind: input, shape index: {}]   ;;  %s525_s1 = inlined_call_operand.hbm [shape: f32[8,128], index: 1, kind: input, shape index: {}]   ;;  %s526_s2 = inlined_call_operand.hbm [shape: f32[424,128], index: 2, kind: input, shape index: {}]   ;;  %s527_s3 = inlined_call_operand.hbm [shape: f32[2,128], index: 3, kind: output, shape index: {}]  }
   0x1   :  { %s9_s14 = sshll.u32 %s524_s0, 4  ;;  %s10_s14 = int_to_ptr.hbm [resolvable:$true] %s9_s14 }
   0x2   :  { %12 = dma.hbm_to_smem %s10_s14, 32, %s419_s15, [#allocation2] }
   0x3   :  { %411 = dma.done.wait [#allocation2], 32 }
   0x4   :  { %412 = vsyncadd [#allocation2], 4294967264 }
   0x5   :  { %15 = sfence }
   0x6   :  { %16 = vsyncpa [#allocation5], 0 }
   0x7   :  { %17 = vsyncpa [#allocation8], 0 }
   0x8   :  { %18 = vsyncpa [#allocation6], 0  ;;  %s24_s18 = sshll.u32 %s525_s1, 4  ;;  %s420_s19 = smov [#allocation4]   ;;  %s25_s18 = int_to_ptr.hbm [resolvable:$true] %s24_s18 }
   0x9   :  { %s26_s20 = sshll.u32 %s420_s19, 4  ;;  %s34_s0 = sshll.u32 %s526_s2, 4  ;;  %s27_s20 = int_to_ptr.vmem [resolvable:$true] %s26_s20  ;;  %s35_s0 = int_to_ptr.hbm [resolvable:$true] %s34_s0 }
   0xa   :  { %29 = dma.hbm_to_vmem [thread:$0]  %s25_s18, 128, %s27_s20, [#allocation5]  }
   0xb   :  { %s421_s23 = smov [#allocation7]   ;;  %s422_s25 = smov 128  }
   0xc   :  { %s36_s24 = sshll.u32 %s421_s23, 4  ;;  %s423_s26 = smov 8   ;;  %s37_s24 = int_to_ptr.vmem [resolvable:$true] %s36_s24 }
   0xd   :  { %42 = dma.hbm_to_vmem [thread:$0]  %s35_s0, 6784, %s37_s24, [#allocation8], %s422_s25, %s422_s25, %s423_s26  }
   0xe   :  { %413 = dma.done.wait [#allocation5], 128  }
   0xf   :  { %414 = vsyncadd [#allocation5], 4294967168 }
  0x10   :  { %415 = dma.done.wait [#allocation8], 6784  }
  0x11   :  { %416 = vsyncadd [#allocation8], 4294960512  ;;  %v186_v0 = vld [vmem:[#allocation7 + $0x78] sm:$0xff]  ;;  %v185_v1 = vld [vmem:[#allocation7 + $0x70] sm:$0xff]  ;;  %s55_s1 = sld [smem:[#allocation3]]  ;;  %v51_v30 = vlaneseq  ;;  %v424_v36 = vmov 0.0  }
  0x12   :  { %188 = vmatpush.msra.mxu1 %v186_v0  ;;  %v184_v2 = vld [vmem:[#allocation7 + $0x68] sm:$0xff]  ;;  %v183_v3 = vld [vmem:[#allocation7 + $0x60] sm:$0xff]  ;;  %v224_v4 = vld [vmem:[#allocation7 + $0xf8] sm:$0xff]  ;;  %s304_s2 = sld [smem:[#allocation3 + $0x1]]  ;;  %s425_s14 = smov [#allocation9]  }
  0x13   :  { %v182_v5 = vld [vmem:[#allocation7 + $0x58] sm:$0xff]  ;;  %225 = vmatpush.msra.mxu2 %v224_v4  ;;  %v223_v6 = vld [vmem:[#allocation7 + $0xf0] sm:$0xff]  ;;  %v222_v7 = vld [vmem:[#allocation7 + $0xe8] sm:$0xff]  ;;  %s311_s27 = sld [smem:[#allocation3 + $0x80]]  ;;  %v464_v31 = vand.u32 127, %v51_v30  ;;  %s291_s15 = sshll.u32 %s425_s14, 4  ;;  %s292_s15 = int_to_ptr.vmem [resolvable:$true] %s291_s15 }
  0x14   :  { %189 = vmatpush.msra.mxu1 %v185_v1  ;;  %v181_v8 = vld [vmem:[#allocation7 + $0x50] sm:$0xff]  ;;  %v221_v9 = vld [vmem:[#allocation7 + $0xe0] sm:$0xff]  ;;  %v180_v10 = vld [vmem:[#allocation7 + $0x48] sm:$0xff]  ;;  %s312_s28 = sld [smem:[#allocation3 + $0x81]]  ;;  %s293_s18 = sshll.u32 %s527_s3, 4  ;;  %s294_s18 = int_to_ptr.hbm [resolvable:$true] %s293_s18 }
  0x15   :  { %226 = vmatpush.msra.mxu2 %v223_v6  ;;  %v220_v11 = vld [vmem:[#allocation7 + $0xd8] sm:$0xff]  ;;  %v179_v12 = vld [vmem:[#allocation7 + $0x40] sm:$0xff]  ;;  %v219_v13 = vld [vmem:[#allocation7 + $0xd0] sm:$0xff]  ;;  %s305_s29 = sld [smem:[#allocation3 + $0x2]] }
  0x16   :  { %190 = vmatpush.msra.mxu1 %v184_v2  ;;  %v178_v14 = vld [vmem:[#allocation7 + $0x38] sm:$0xff]  ;;  %v218_v15 = vld [vmem:[#allocation7 + $0xc8] sm:$0xff]  ;;  %v177_v16 = vld [vmem:[#allocation7 + $0x30] sm:$0xff]  ;;  %s455_s30 = sld [smem:[#allocation3 + $0x3]] }
  0x17   :  { %227 = vmatpush.msra.mxu2 %v222_v7  ;;  %v217_v17 = vld [vmem:[#allocation7 + $0xc0] sm:$0xff]  ;;  %v176_v18 = vld [vmem:[#allocation7 + $0x28] sm:$0xff]  ;;  %v216_v19 = vld [vmem:[#allocation7 + $0xb8] sm:$0xff]  ;;  %s313_s4 = sld [smem:[#allocation3 + $0x82]]  ;;  %v56_v32 = vstv %s55_s1 }
  0x18   :  { %191 = vmatpush.msra.mxu1 %v183_v3  ;;  %v175_v20 = vld [vmem:[#allocation7 + $0x20] sm:$0xff]  ;;  %v215_v21 = vld [vmem:[#allocation7 + $0xb0] sm:$0xff]  ;;  %v174_v22 = vld [vmem:[#allocation7 + $0x18] sm:$0xff]  ;;  %s457_s5 = sld [smem:[#allocation3 + $0x4]]  ;;  %v61_v33 = vstv %s304_s2  ;;  %vm57_vm0 = vcmp.eq.s32.totalorder %v464_v31, %v56_v32 }
  0x19   :  { %228 = vmatpush.msra.mxu2 %v221_v9  ;;  %v214_v23 = vld [vmem:[#allocation7 + $0xa8] sm:$0xff]  ;;  %v173_v24 = vld [vmem:[#allocation7 + $0x10] sm:$0xff]  ;;  %v213_v25 = vld [vmem:[#allocation7 + $0xa0] sm:$0xff]  ;;  %s459_s6 = sld [smem:[#allocation3 + $0x83]]  ;;  %v99_v34 = vstv %s311_s27  ;;  %vm62_vm1 = vcmp.eq.s32.totalorder %v464_v31, %v61_v33  ;;  %v58_v37 = vsel %vm57_vm0, 1.0, %v424_v36 }
  0x1a   :  { %192 = vmatpush.msra.mxu1 %v182_v5  ;;  %v172_v26 = vld [vmem:[#allocation7 + $0x8] sm:$0xff]  ;;  %v212_v27 = vld [vmem:[#allocation7 + $0x98] sm:$0xff]  ;;  %v171_v28 = vld [vmem:[#allocation7] sm:$0xff]  ;;  %s461_s7 = sld [smem:[#allocation3 + $0x84]]  ;;  %v104_v35 = vstv %s312_s28  ;;  %vm100_vm2 = vcmp.eq.s32.totalorder %v464_v31, %v99_v34  ;;  %v63_v38 = vsel %vm62_vm1, 1.0, %v424_v36 }
  0x1b   :  { %229 = vmatpush.msra.mxu2 %v220_v11  ;;  %v170_v29 = vld [vmem:[#allocation4] ss:$4 sm:$0x3]  ;;  %s466_s8 = sld [smem:[#allocation3 + $0x5]]  ;;  %v66_v39 = vstv %s305_s29  ;;  %v101_v40 = vsel %vm100_vm2, 1.0, %v424_v36  ;;  %v64_v41 = vadd.f32 %v63_v38, %v58_v37  ;;  %vm105_vm4 = vcmp.eq.s32.totalorder %v464_v31, %v104_v35  ;;  %v211_v55 = vld [vmem:[#allocation7 + $0x90] sm:$0xff] }
  0x1c   :  { %193 = vmatpush.msra.mxu1 %v181_v8  ;;  %s468_s9 = sld [smem:[#allocation3 + $0x6]]  ;;  %vm67_vm3 = vcmp.eq.s32.totalorder %v464_v31, %v66_v39  ;;  %v71_v44 = vstv %s455_s30  ;;  %v106_v45 = vsel %vm105_vm4, 1.0, %v424_v36  ;;  %v210_v62 = vld [vmem:[#allocation7 + $0x88] sm:$0xff]  ;;  %v144_v5 = vld [vmem:[#allocation7 + $0x198] sm:$0xff]  ;;  %v209_v6 = vld [vmem:[#allocation7 + $0x80] sm:$0xff]  ;;  %vm145_vm2 = vcmask 261120  }
  0x1d   :  { %230 = vmatpush.msra.mxu2 %v219_v13  ;;  %s473_s10 = sld [smem:[#allocation3 + $0x85]]  ;;  %v109_v42 = vstv %s313_s4  ;;  %v68_v43 = vsel %vm67_vm3, 1.0, %v424_v36  ;;  %vm72_vm6 = vcmp.eq.s32.totalorder %v464_v31, %v71_v44  ;;  %v107_v47 = vadd.f32 %v106_v45, %v101_v40  ;;  %161 = vmatpush.msra.mxu0 %v144_v5  ;;  %v143_v13 = vld [vmem:[#allocation7 + $0x190] sm:$0xff]  ;;  %v257_v32 = vld [vmem:[#allocation7 + $0x148] sm:$0xff]  ;;  %v256_v33 = vld [vmem:[#allocation7 + $0x140] sm:$0xff] }
  0x1e   :  { %194 = vmatpush.msra.mxu1 %v180_v10  ;;  %s478_s11 = sld [smem:[#allocation3 + $0x86]]  ;;  %vm110_vm5 = vcmp.eq.s32.totalorder %v464_v31, %v109_v42  ;;  %v69_v46 = vadd.f32 %v68_v43, %v64_v41  ;;  %v73_v49 = vsel %vm72_vm6, 1.0, %v424_v36  ;;  %v76_v50 = vstv %s457_s5  ;;  %v255_v34 = vld [vmem:[#allocation7 + $0x138] sm:$0xff]  ;;  %v254_v35 = vld [vmem:[#allocation7 + $0x130] sm:$0xff]  ;;  %v169_v37 = vld [vmem:[#allocation7 + $0x1a0] sm:$0xff] }
  0x1f   :  { %231 = vmatpush.msra.mxu2 %v218_v15  ;;  %s484_s12 = sld [smem:[#allocation3 + $0x7]]  ;;  %v111_v48 = vsel %vm110_vm5, 1.0, %v424_v36  ;;  %v114_v51 = vstv %s459_s6  ;;  %vm77_vm7 = vcmp.eq.s32.totalorder %v464_v31, %v76_v50  ;;  %v52_v15 = vshrl.u32 %v51_v30, 7  ;;  %162 = vmatpush.msra.mxu0 %v143_v13  ;;  %v259_v30 = vld [vmem:[#allocation7 + $0x158] sm:$0xff]  ;;  %v252_v38 = vld [vmem:[#allocation7 + $0x120] sm:$0xff]  ;;  %v250_v44 = vld [vmem:[#allocation7 + $0x110] sm:$0xff] }
  0x20   :  { %195 = vmatpush.msra.mxu1 %v179_v12  ;;  %v119_v52 = vstv %s461_s7  ;;  %s494_s13 = sld [smem:[#allocation3 + $0x87]]  ;;  %v74_v53 = vadd.f32 %v73_v49, %v69_v46  ;;  %v112_v54 = vadd.f32 %v111_v48, %v107_v47  ;;  %vm115_vm8 = vcmp.eq.s32.totalorder %v464_v31, %v114_v51  ;;  %v251_v43 = vld [vmem:[#allocation7 + $0x118] sm:$0xff]  ;;  %v249_v45 = vld [vmem:[#allocation7 + $0x108] sm:$0xff]  ;;  %v248_v46 = vld [vmem:[#allocation7 + $0x100] sm:$0xff] }
  0x21   :  { %232 = vmatpush.msra.mxu2 %v217_v17  ;;  %v78_v56 = vsel %vm77_vm7, 1.0, %v424_v36  ;;  %v81_v57 = vstv %s466_s8  ;;  %v116_v58 = vsel %vm115_vm8, 1.0, %v424_v36  ;;  %vm120_vm9 = vcmp.eq.s32.totalorder %v464_v31, %v119_v52 }
  0x22   :  { %196 = vmatpush.msra.mxu1 %v178_v14  ;;  %v79_v59 = vadd.f32 %v78_v56, %v74_v53  ;;  %vm82_vm10 = vcmp.eq.s32.totalorder %v464_v31, %v81_v57  ;;  %v117_v60 = vadd.f32 %v116_v58, %v112_v54  ;;  %v121_v61 = vsel %vm120_vm9, 1.0, %v424_v36  ;;  %v142_v14 = vld [vmem:[#allocation7 + $0x188] sm:$0xff] }
  0x23   :  { %233 = vmatpush.msra.mxu2 %v216_v19  ;;  %v83_v63 = vsel %vm82_vm10, 1.0, %v424_v36  ;;  %v86_v0 = vstv %s468_s9  ;;  %v124_v1 = vstv %s473_s10  ;;  %vm95_vm0 = vcmp.eq.s32.totalorder %v52_v15, 0  ;;  %163 = vmatpush.msra.mxu0 %v142_v14 }
  0x24   :  { %197 = vmatpush.msra.mxu1 %v177_v16  ;;  %v129_v2 = vstv %s478_s11  ;;  %v84_v3 = vadd.f32 %v83_v63, %v79_v59  ;;  %vm87_vm11 = vcmp.eq.s32.totalorder %v464_v31, %v86_v0  ;;  %v122_v4 = vadd.f32 %v121_v61, %v117_v60 }
  0x25   :  { %234 = vmatpush.msra.mxu2 %v215_v21  ;;  %vm125_vm12 = vcmp.eq.s32.totalorder %v464_v31, %v124_v1  ;;  %v88_v7 = vsel %vm87_vm11, 1.0, %v424_v36  ;;  %v91_v8 = vstv %s484_s12  ;;  %vm130_vm13 = vcmp.eq.s32.totalorder %v464_v31, %v129_v2  ;;  %v262_v21 = vld [vmem:[#allocation7 + $0x170] sm:$0xff] }
  0x26   :  { %198 = vmatpush.msra.mxu1 %v176_v18  ;;  %v126_v9 = vsel %vm125_vm12, 1.0, %v424_v36  ;;  %v89_v10 = vadd.f32 %v88_v7, %v84_v3  ;;  %vm92_vm14 = vcmp.eq.s32.totalorder %v464_v31, %v91_v8  ;;  %v131_v12 = vsel %vm130_vm13, 1.0, %v424_v36 }
  0x27   :  { %235 = vmatpush.msra.mxu2 %v214_v23  ;;  %v127_v11 = vadd.f32 %v126_v9, %v122_v4  ;;  %v93_v16 = vsel %vm92_vm14, 1.0, %v424_v36  ;;  %v134_v17 = vstv %s494_s13  ;;  %vm138_vm1 = vcmp.eq.s32.totalorder %v52_v15, 1 }
  0x28   :  { %199 = vmatpush.msra.mxu1 %v175_v20  ;;  %v94_v18 = vadd.f32 %v93_v16, %v89_v10  ;;  %vm135_vm15 = vcmp.eq.s32.totalorder %v464_v31, %v134_v17  ;;  %v263_v20 = vld [vmem:[#allocation7 + $0x178] sm:$0xff]  ;;  %v258_v31 = vld [vmem:[#allocation7 + $0x150] sm:$0xff]  ;;  %v187_v39 = vperm.slane %v169_v37, 0  ;;  %v245_v48 = vperm.slane %v169_v37, 1 }
  0x29   :  { %236 = vmatpush.msra.mxu2 %v213_v25  ;;  %v132_v19 = vadd.f32 %v131_v12, %v127_v11  ;;  %v136_v23 = vsel %vm135_vm15, 1.0, %v424_v36  ;;  %265 = vmatpush.msra.mxu3 %v263_v20  ;;  %v253_v36 = vld [vmem:[#allocation7 + $0x128] sm:$0xff]  ;;  %v264_v53 = vperm.slane %v169_v37, 2 }
  0x2a   :  { %200 = vmatpush.msra.mxu1 %v174_v22  ;;  %v141_v22 = vld [vmem:[#allocation7 + $0x180] sm:$0xff] }
  0x2b   :  { %237 = vmatpush.msra.mxu2 %v212_v27  ;;  %v137_v25 = vadd.f32 %v136_v23, %v132_v19  ;;  %266 = vmatpush.msra.mxu3 %v262_v21 }
  0x2c   :  { %201 = vmatpush.msra.mxu1 %v173_v24  ;;  %v96_v24 = vsel %vm95_vm0, %v94_v18, 0.0  ;;  %164 = vmatpush.msra.mxu0 %v141_v22 }
  0x2d   :  { %238 = vmatpush.msra.mxu2 %v211_v55  ;;  %v139_v27 = vsel %vm138_vm1, %v137_v25, 0.0 }
  0x2e   :  { %202 = vmatpush.msra.mxu1 %v172_v26  ;;  %v261_v26 = vld [vmem:[#allocation7 + $0x168] sm:$0xff] }
  0x2f   :  { %239 = vmatpush.msra.mxu2 %v210_v62  ;;  %267 = vmatpush.msra.mxu3 %v261_v26 }
  0x30   :  { %203 = vmatpush.msra.mxu1 %v171_v28  ;;  %v260_v28 = vld [vmem:[#allocation7 + $0x160] sm:$0xff] }
  0x31   :  { %204 = vmatmul.f32.vlgmr.msra.gmra.mxu1 %v170_v29  ;;  %240 = vmatpush.msra.mxu2 %v209_v6  ;;  %v140_v29 = vadd.f32 %v139_v27, %v96_v24 }
  0x32   :  { %268 = vmatpush.msra.mxu3 %v260_v28 }
  0x33   :  { %319 = vmatmul.msk.f32.vlgmr.msra.gmra.mxu0 %vm145_vm2, %v140_v29 }
  0x34   :  { %269 = vmatpush.msra.mxu3 %v259_v30 }
  0x36   :  { %270 = vmatpush.msra.mxu3 %v258_v31 }
  0x38   :  { %271 = vmatpush.msra.mxu3 %v257_v32 }
  0x3a   :  { %272 = vmatpush.msra.mxu3 %v256_v33 }
  0x3c   :  { %273 = vmatpush.msra.mxu3 %v255_v34 }
  0x3e   :  { %274 = vmatpush.msra.mxu3 %v254_v35 }
  0x40   :  { %275 = vmatpush.msra.mxu3 %v253_v36 }
  0x42   :  { %276 = vmatpush.msra.mxu3 %v252_v38 }
  0x44   :  { %277 = vmatpush.msra.mxu3 %v251_v43 }
  0x46   :  { %278 = vmatpush.msra.mxu3 %v250_v44 }
  0x48   :  { %279 = vmatpush.msra.mxu3 %v249_v45 }
  0x4a   :  { %280 = vmatpush.msra.mxu3 %v248_v46 }
  0xae   :  { %v205_v40 = vpop.f32.mrf.mxu1 }
  0xaf   :  { %v206_v41 = vadd.f32 %v205_v40, %v187_v39 }
  0xb0   :  { %v166_v47 = vpop.f32.mrf.mxu0 }
  0xb1   :  { %v208_v42 = vmax.f32 %v206_v41, 0.0 }
  0xb3   :  { %241 = vmatmul.f32.vlgmr.msra.gmra.mxu2 %v208_v42 }
 0x136   :  { %v242_v49 = vpop.f32.mrf.mxu2 }
 0x137   :  { %v243_v50 = vadd.f32 %v242_v49, %v166_v47 }
 0x139   :  { %v246_v51 = vadd.f32 %v245_v48, %v243_v50 }
 0x13b   :  { %v247_v52 = vmax.f32 %v246_v51, 0.0 }
 0x13d   :  { %281 = vmatmul.f32.vlgmr.msra.gmra.mxu3 %v247_v52 }
 0x1c0   :  { %v282_v54 = vpop.f32.mrf.mxu3 }
 0x1c1   :  { %v283_v55 = vadd.f32 %v282_v54, %v264_v53 }
 0x1c3   :  { %285 = vst [vmem:[#allocation9] sm:$0x3] %v283_v55 }
 0x1c4   :  { %296 = dma.vmem_to_hbm [thread:$0]  %s292_s15, 32, %s294_s18, [#allocation6]  }
 0x1c5   :  { %417 = dma.done.wait [#allocation6], 32  }
 0x1c6   :  { %418 = vsyncadd [#allocation6], 4294967264 }
 0x1c7   :  { %301 = vsyncpa [#allocation5], 1 }
 0x1c8   :  { %302 = vsyncpa [#allocation8], 1 }
 0x1c9   :  { %303 = vsyncpa [#allocation6], 1 }

</bundles_post_ra>
